<compile_context>
chip_gen: v6e
topology: v6e:2x2x1
jax: 0.10.0
libtpu: 0.0.40
codegen_flags: <defaults>
</compile_context>

<pallas_src>
import jax
import jax.numpy as jnp
from jax.experimental import pallas as pl
from jax.experimental.pallas import tpu as pltpu

LANES = 128
TM_MAX = 4096      # rows per grid step -> 2 MiB per f32 input buffer
CHUNK = 64         # rows per inner-loop slice (8 vregs/array -> no spills)


def _make_dice_kernel(tm, chunk, steps, rows, full_blocks, all_full):
    n_chunks = tm // chunk

    def tile_partial_sums(x_ref, t_ref, block_idx, masked):
        # Accumulate sum(xb*t) and sum(xb+t) for one (tm, 128) tile into two
        # (8, 128) f32 vreg accumulators, reading `chunk`-row slices so live
        # vregs stay small (pure VPU adds, no XLU, no spills).
        def body(c, carry):
            acc_i, acc_d = carry
            off = pl.multiple_of(c * chunk, chunk)
            x = x_ref[pl.ds(off, chunk), :].astype(jnp.float32)
            t = t_ref[pl.ds(off, chunk), :].astype(jnp.float32)
            xb = jnp.where(x >= 0.5, 1.0, 0.0)
            if masked:
                # Only emitted for ragged / overflow blocks: zero rows whose
                # global row index is past the logical end of the array.
                row_ids = (block_idx * tm + off
                           + jax.lax.broadcasted_iota(jnp.int32, (chunk, 1), 0))
                valid = row_ids < rows
                xb = jnp.where(valid, xb, 0.0)
                t = jnp.where(valid, t, 0.0)
            inter = xb * t          # numerator stream
            den = xb + t            # sum(xb) + sum(t) fused into one stream
            acc_i = acc_i + jnp.sum(inter.reshape(chunk // 8, 8, LANES), axis=0)
            acc_d = acc_d + jnp.sum(den.reshape(chunk // 8, 8, LANES), axis=0)
            return acc_i, acc_d

        zero = jnp.zeros((8, LANES), jnp.float32)
        if n_chunks == 1:
            return body(0, (zero, zero))
        return jax.lax.fori_loop(0, n_chunks, body, (zero, zero),
                                 unroll=min(2, n_chunks))

    def kernel(x_ref, t_ref, o_ref):
        c = pl.program_id(0)          # core ("parallel") axis
        i = pl.program_id(1)          # sequential reduction axis
        lb = c * steps + i            # logical block index over the row range

        @pl.when(i == 0)
        def _():
            o_ref[...] = jnp.zeros_like(o_ref)

        def accumulate(masked):
            acc_i, acc_d = tile_partial_sums(x_ref, t_ref, lb, masked)
            o_ref[0, 0] += acc_i
            o_ref[0, 1] += acc_d

        if all_full:
            accumulate(False)         # no masking anywhere (static fast path)
        else:
            @pl.when(lb < full_blocks)
            def _():
                accumulate(False)     # fully in-bounds tiles: no mask ops

            @pl.when(lb >= full_blocks)
            def _():
                accumulate(True)      # ragged / redundant tiles: row mask

    return kernel


def dice_loss_integer(inputs, targets, smooth=1.0):
    # Flatten, keep native dtypes (threshold/cast happens in-kernel).
    x = inputs.reshape(-1)
    t = targets.reshape(-1)
    n = x.shape[0]
    smooth = float(smooth)

    # 128-lane-aligned prefix goes to the kernel; the tiny remainder (<1024
    # elements worst case) is reduced in plain JAX -- no full-array pad copy.
    n_main = (n // LANES) * LANES
    if n_main // LANES < 8:
        n_main = 0
    rows = n_main // LANES

    if n_main < n:
        xt = x[n_main:].astype(jnp.float32)
        tt = t[n_main:].astype(jnp.float32)
        xtb = jnp.where(xt >= 0.5, 1.0, 0.0)
        tail_inter = jnp.sum(xtb * tt)
        tail_denom = jnp.sum(xtb + tt)
    else:
        tail_inter = jnp.float32(0.0)
        tail_denom = jnp.float32(0.0)

    if rows == 0:
        # Degenerate tiny input: everything handled by the tail reduction.
        inter = tail_inter
        denom = tail_denom
    else:
        # TODO(synk): when n % 128 != 0 the aligned-prefix slice below may
        # still materialize a copy in XLA; a fully fused path would mask the
        # ragged lanes in-kernel from a 1-D layout.
        x2 = x[:n_main].reshape(rows, LANES)   # free reshape (lane dim = 128)
        t2 = t[:n_main].reshape(rows, LANES)

        # Split the row range across TensorCores (2x on v7x, no-op on 1-TC).
        ncores = 2 if rows >= 128 else 1
        rows_per_core = pl.cdiv(rows, ncores)
        if rows_per_core >= CHUNK:
            tm = min(TM_MAX, (rows_per_core // CHUNK) * CHUNK)
            chunk = CHUNK
        else:
            tm = (rows_per_core // 8) * 8      # >= 8, multiple of 8
            chunk = tm
        steps = pl.cdiv(rows_per_core, tm)

        last_block = pl.cdiv(rows, tm) - 1     # clamp so no DMA is fully OOB
        full_blocks = rows // tm               # blocks that need no masking
        all_full = (ncores * steps * tm == rows)

        def in_index_map(c, i):
            return (jnp.minimum(c * steps + i, last_block), 0)

        kernel = _make_dice_kernel(tm, chunk, steps, rows, full_blocks, all_full)

        # NOTE: per-(sublane,lane) f32 accumulation of 0/1 counts is exact to
        # ~2^34 elements; only the final reduce matches the f32 reference.
        partials = pl.pallas_call(
            kernel,
            out_shape=jax.ShapeDtypeStruct((ncores, 2, 8, LANES), jnp.float32),
            grid_spec=pltpu.PrefetchScalarGridSpec(
                num_scalar_prefetch=0,
                grid=(ncores, steps),
                in_specs=[
                    pl.BlockSpec((tm, LANES), in_index_map),
                    pl.BlockSpec((tm, LANES), in_index_map),
                ],
                out_specs=pl.BlockSpec((1, 2, 8, LANES),
                                       lambda c, i: (c, 0, 0, 0)),
            ),
            compiler_params=pltpu.CompilerParams(
                dimension_semantics=("parallel", "arbitrary"),
                vmem_limit_bytes=32 * 1024 * 1024,
            ),
        )(x2, t2)

        sums = jnp.sum(partials, axis=(0, 2, 3))   # (2,) = [inter, denom]
        inter = sums[0] + tail_inter
        denom = sums[1] + tail_denom

    dice = (2.0 * inter + smooth) / (denom + smooth)
    return 1.0 - dice


def _reference(inputs, targets, smooth=1.0):
    x = inputs.reshape(-1).astype(jnp.float32)
    x = jnp.where(x >= 0.5, 1.0, 0.0)
    t = targets.reshape(-1).astype(jnp.float32)
    inter = jnp.sum(x * t)
    dice = (2.0 * inter + smooth) / (jnp.sum(x) + jnp.sum(t) + smooth)
    return 1.0 - dice


if __name__ == "__main__":
    key = jax.random.PRNGKey(0)
    k1, k2, k3, k4, k5, k6 = jax.random.split(key, 6)

    # Primary test: shape implied by the module (probabilities vs binary mask).
    inputs = jax.random.uniform(k1, (2, 4, 16, 16), dtype=jnp.float32)
    targets = (jax.random.uniform(k2, (2, 4, 16, 16)) > 0.5).astype(jnp.float32)
    loss = dice_loss_integer(inputs, targets)
    jax.block_until_ready(loss)
    ref = _reference(inputs, targets)
    assert jnp.allclose(loss, ref, atol=1e-5, rtol=1e-5), (loss, ref)

    # Secondary test: ragged row count -> masked-block path.
    inputs2 = jax.random.uniform(k3, (2, 4, 17, 16), dtype=jnp.float32)
    targets2 = (jax.random.uniform(k4, (2, 4, 17, 16)) > 0.5).astype(jnp.float32)
    loss2 = dice_loss_integer(inputs2, targets2)
    jax.block_until_ready(loss2)
    ref2 = _reference(inputs2, targets2)
    assert jnp.allclose(loss2, ref2, atol=1e-5, rtol=1e-5), (loss2, ref2)

    # Third test: big enough to exercise the chunked inner loop and the
    # 2-way "parallel" core axis (1024 rows of 128 lanes).
    inputs3 = jax.random.uniform(k5, (4, 4, 64, 128), dtype=jnp.float32)
    targets3 = (jax.random.uniform(k6, (4, 4, 64, 128)) > 0.5).astype(jnp.float32)
    loss3 = dice_loss_integer(inputs3, targets3)
    jax.block_until_ready(loss3)
    ref3 = _reference(inputs3, targets3)
    assert jnp.allclose(loss3, ref3, atol=1e-5, rtol=1e-5), (loss3, ref3)

    print("KERNEL_OK")
</pallas_src>

<mosaic_0001>
module attributes {stable_mosaic.version = 11 : i64} {
  func.func @kernel(%arg0: i32, %arg1: i32, %arg2: memref<16x128xf32, #tpu.memory_space<vmem>>, %arg3: memref<16x128xf32, #tpu.memory_space<vmem>>, %arg4: memref<1x2x8x128xf32, #tpu.memory_space<vmem>>) attributes {dimension_semantics = [#tpu.dimension_semantics<parallel>, #tpu.dimension_semantics<arbitrary>], iteration_bounds = array<i64: 1, 1>, scalar_prefetch = 0 : i64, scratch_operands = 0 : i64, tpu.core_type = #tpu.core_type<tc>, window_params = [{transform_indices = @transform_0, window_bounds = array<i64: 16, 128>}, {transform_indices = @transform_1, window_bounds = array<i64: 16, 128>}, {transform_indices = @transform_2, window_bounds = array<i64: 1, 2, 8, 128>}]} {
    %c0_i32 = arith.constant 0 : i32
    %0 = arith.cmpi eq, %arg1, %c0_i32 : i32
    %1 = arith.extui %0 : i1 to i32
    %c0_i32_0 = arith.constant 0 : i32
    %2 = arith.cmpi ne, %1, %c0_i32_0 : i32
    scf.if %2 {
      %cst_23 = arith.constant 0.000000e+00 : f32
      %34 = vector.broadcast %cst_23 : f32 to vector<1x2x8x128xf32>
      %c0_24 = arith.constant 0 : index
      %c0_25 = arith.constant 0 : index
      %c0_26 = arith.constant 0 : index
      %c0_27 = arith.constant 0 : index
      %35 = vector.load %arg4[%c0_24, %c0_25, %c0_26, %c0_27] : memref<1x2x8x128xf32, #tpu.memory_space<vmem>>, vector<1x2x8x128xf32>
      tpu.vector_store %arg4[%c0_24, %c0_25, %c0_26, %c0_27], %34 {strides = array<i32>} : memref<1x2x8x128xf32, #tpu.memory_space<vmem>>, vector<1x2x8x128xf32>,
    } else {
    }
    %cst = arith.constant 0.000000e+00 : f32
    %3 = vector.broadcast %cst : f32 to vector<8x128xf32>
    %c0_i32_1 = arith.constant 0 : i32
    %4 = tpu.assume_multiple %c0_i32_1, 16 : i32
    %5 = arith.index_cast %4 : i32 to index
    %c0 = arith.constant 0 : index
    %6 = vector.load %arg2[%5, %c0] : memref<16x128xf32, #tpu.memory_space<vmem>>, vector<16x128xf32>
    %7 = arith.index_cast %4 : i32 to index
    %c0_2 = arith.constant 0 : index
    %8 = vector.load %arg3[%7, %c0_2] : memref<16x128xf32, #tpu.memory_space<vmem>>, vector<16x128xf32>
    %cst_3 = arith.constant 5.000000e-01 : f32
    %9 = vector.broadcast %cst_3 : f32 to vector<16x128xf32>
    %10 = arith.cmpf oge, %6, %9 : vector<16x128xf32>
    %cst_4 = arith.constant 1.000000e+00 : f32
    %cst_5 = arith.constant 0.000000e+00 : f32
    %11 = vector.broadcast %cst_4 : f32 to vector<16x128xf32>
    %12 = vector.broadcast %cst_5 : f32 to vector<16x128xf32>
    %13 = arith.select %10, %11, %12 : vector<16x128xi1>, vector<16x128xf32>
    %14 = arith.mulf %13, %8 : vector<16x128xf32>
    %15 = arith.addf %13, %8 : vector<16x128xf32>
    %16 = vector.shape_cast %14 : vector<16x128xf32> to vector<2x8x128xf32>
    %cst_6 = arith.constant dense<0.000000e+00> : vector<8x128xf32>
    %17 = vector.multi_reduction <add>, %16, %cst_6 [0] : vector<2x8x128xf32> to vector<8x128xf32>
    %18 = arith.addf %3, %17 : vector<8x128xf32>
    %19 = vector.shape_cast %15 : vector<16x128xf32> to vector<2x8x128xf32>
    %cst_7 = arith.constant dense<0.000000e+00> : vector<8x128xf32>
    %20 = vector.multi_reduction <add>, %19, %cst_7 [0] : vector<2x8x128xf32> to vector<8x128xf32>
    %21 = arith.addf %3, %20 : vector<8x128xf32>
    %c0_8 = arith.constant 0 : index
    %c0_9 = arith.constant 0 : index
    %c0_10 = arith.constant 0 : index
    %c0_11 = arith.constant 0 : index
    %22 = vector.load %arg4[%c0_8, %c0_9, %c0_10, %c0_11] : memref<1x2x8x128xf32, #tpu.memory_space<vmem>>, vector<1x1x8x128xf32>
    %23 = vector.shape_cast %22 : vector<1x1x8x128xf32> to vector<8x128xf32>
    %24 = arith.addf %23, %18 : vector<8x128xf32>
    %c0_12 = arith.constant 0 : index
    %c0_13 = arith.constant 0 : index
    %c0_14 = arith.constant 0 : index
    %c0_15 = arith.constant 0 : index
    %25 = vector.load %arg4[%c0_12, %c0_13, %c0_14, %c0_15] : memref<1x2x8x128xf32, #tpu.memory_space<vmem>>, vector<1x1x8x128xf32>
    %26 = vector.shape_cast %25 : vector<1x1x8x128xf32> to vector<8x128xf32>
    %27 = vector.shape_cast %24 : vector<8x128xf32> to vector<1x1x8x128xf32>
    tpu.vector_store %arg4[%c0_12, %c0_13, %c0_14, %c0_15], %27 {strides = array<i32>} : memref<1x2x8x128xf32, #tpu.memory_space<vmem>>, vector<1x1x8x128xf32>,
    %c0_16 = arith.constant 0 : index
    %c1 = arith.constant 1 : index
    %c0_17 = arith.constant 0 : index
    %c0_18 = arith.constant 0 : index
    %28 = vector.load %arg4[%c0_16, %c1, %c0_17, %c0_18] : memref<1x2x8x128xf32, #tpu.memory_space<vmem>>, vector<1x1x8x128xf32>
    %29 = vector.shape_cast %28 : vector<1x1x8x128xf32> to vector<8x128xf32>
    %30 = arith.addf %29, %21 : vector<8x128xf32>
    %c0_19 = arith.constant 0 : index
    %c1_20 = arith.constant 1 : index
    %c0_21 = arith.constant 0 : index
    %c0_22 = arith.constant 0 : index
    %31 = vector.load %arg4[%c0_19, %c1_20, %c0_21, %c0_22] : memref<1x2x8x128xf32, #tpu.memory_space<vmem>>, vector<1x1x8x128xf32>
    %32 = vector.shape_cast %31 : vector<1x1x8x128xf32> to vector<8x128xf32>
    %33 = vector.shape_cast %30 : vector<8x128xf32> to vector<1x1x8x128xf32>
    tpu.vector_store %arg4[%c0_19, %c1_20, %c0_21, %c0_22], %33 {strides = array<i32>} : memref<1x2x8x128xf32, #tpu.memory_space<vmem>>, vector<1x1x8x128xf32>,
    return
  }
  func.func @transform_0(%arg0: i32, %arg1: i32) -> (i32, i32) {
    %c1_i32 = arith.constant 1 : i32
    %0 = arith.muli %arg0, %c1_i32 : i32
    %1 = arith.addi %0, %arg1 : i32
    %c0_i32 = arith.constant 0 : i32
    %2 = arith.minsi %1, %c0_i32 : i32
    %c0_i32_0 = arith.constant 0 : i32
    %c0_i32_1 = arith.constant 0 : i32
    return %2, %c0_i32_0 : i32, i32
  }
  func.func @transform_1(%arg0: i32, %arg1: i32) -> (i32, i32) {
    %c1_i32 = arith.constant 1 : i32
    %0 = arith.muli %arg0, %c1_i32 : i32
    %1 = arith.addi %0, %arg1 : i32
    %c0_i32 = arith.constant 0 : i32
    %2 = arith.minsi %1, %c0_i32 : i32
    %c0_i32_0 = arith.constant 0 : i32
    %c0_i32_1 = arith.constant 0 : i32
    return %2, %c0_i32_0 : i32, i32
  }
  func.func @transform_2(%arg0: i32, %arg1: i32) -> (i32, i32, i32, i32) {
    %c0_i32 = arith.constant 0 : i32
    %c0_i32_0 = arith.constant 0 : i32
    %c0_i32_1 = arith.constant 0 : i32
    %c0_i32_2 = arith.constant 0 : i32
    return %arg0, %c0_i32, %c0_i32_0, %c0_i32_1 : i32, i32, i32, i32
  }
}

</mosaic_0001>

<bundles_post_ra>
// kernel: tpu_custom_call.1
= control target key start
LH: loop header
LB: loop body
LE: loop exit
PB: predicated region body
PF: predicated region fallthrough
CT: control target
= control target key end

     0   :  { %7 = vsyncpa [#allocation3], 0  ;;  %s222_s0 = inlined_call_operand.hbm [shape: f32[16,128], index: 0, kind: input, shape index: {}]   ;;  %s223_s1 = inlined_call_operand.hbm [shape: f32[16,128], index: 1, kind: input, shape index: {}]   ;;  %s224_s2 = inlined_call_operand.hbm [shape: f32[1,2,8,128], index: 2, kind: output, shape index: {}]  }
   0x1   :  { %8 = vsyncpa [#allocation6], 0 }
   0x2   :  { %9 = vsyncpa [#allocation4], 0  ;;  %s183_s9 = smov [#allocation2]  }
   0x3   :  { %s21_s10 = sshll.u32 %s183_s9, 4  ;;  %s22_s10 = int_to_ptr.vmem [resolvable:$true] %s21_s10 }
   0x4   :  { %s125_s11 = scalar_lea.vmem %s22_s10, 256  ;;  %p130_p1 = scmp.lt.s32.totalorder %s22_s10, %s22_s10 }
   0x5   :  { %p126_p0 = scmp.ne.s32.totalorder %s22_s10, %s125_s11  ;;  %p131_p2 = scmp.lt.s32.totalorder %s125_s11, %s125_s11 }
   0x7   :  { %p132_p3 = por %p131_p2, %p130_p1 }
   0x9   :  { %p133_p4 = pnand %p132_p3, %p126_p0 }
   0xb   :  { %136 = shalt.err (!%p133_p4)
}
   0xc   :  { %s184_s12 = smov 128   ;;  %s185_s13 = smov 8  }
   0xd   :  { %27 = dma.hbm_to_vmem [thread:$0]  %s222_s0, 256, %s22_s10, [#allocation3], %s184_s12, %s184_s12, %s185_s13  }
   0xe   :  { %s186_s16 = smov [#allocation5]  }
   0xf   :  { %s39_s17 = sshll.u32 %s186_s16, 4  ;;  %s40_s17 = int_to_ptr.vmem [resolvable:$true] %s39_s17 }
  0x10   :  { %s145_s18 = scalar_lea.vmem %s40_s17, 256  ;;  %p150_p6 = scmp.lt.s32.totalorder %s40_s17, %s40_s17 }
  0x11   :  { %p146_p5 = scmp.ne.s32.totalorder %s40_s17, %s145_s18  ;;  %p151_p7 = scmp.lt.s32.totalorder %s145_s18, %s145_s18 }
  0x13   :  { %p152_p8 = por %p151_p7, %p150_p6 }
  0x15   :  { %p153_p9 = pnand %p152_p8, %p146_p5 }
  0x17   :  { %156 = shalt.err (!%p153_p9)
}
  0x18   :  { %45 = dma.hbm_to_vmem [thread:$0]  %s223_s1, 256, %s40_s17, [#allocation6], %s184_s12, %s184_s12, %s185_s13  }
  0x19   :  { %177 = dma.done.wait [#allocation3], 256  }
  0x1a   :  { %178 = vsyncadd [#allocation3], 4294967040 }
  0x1b   :  { %179 = dma.done.wait [#allocation6], 256  }
  0x1c   :  { %180 = vsyncadd [#allocation6], 4294967040  ;;  %v66_v0 = vld [vmem:[#allocation2] sm:$0xff]  ;;  %v67_v1 = vld [vmem:[#allocation2 + $0x8] sm:$0xff]  ;;  %v187_v4 = vmov 0.0   ;;  %s188_s0 = smov [#allocation7]  }
  0x1d   :  { %v68_v2 = vld [vmem:[#allocation5] sm:$0xff]  ;;  %vm70_vm0 = vcmp.ge.f32.partialorder %v66_v0, 0.5  ;;  %vm71_vm1 = vcmp.ge.f32.partialorder %v67_v1, 0.5  ;;  %v69_v3 = vld [vmem:[#allocation5 + $0x8] sm:$0xff]  ;;  %s94_s21 = sshll.u32 %s188_s0, 4  ;;  %s95_s21 = int_to_ptr.vmem [resolvable:$true] %s94_s21 }
  0x1e   :  { %v72_v5 = vsel %vm70_vm0, 1.0, %v187_v4  ;;  %v73_v6 = vsel %vm71_vm1, 1.0, %v187_v4  ;;  %s157_s1 = scalar_lea.vmem %s95_s21, 256  ;;  %p162_p11 = scmp.lt.s32.totalorder %s95_s21, %s95_s21 }
  0x1f   :  { %v74_v7 = vmul.f32 %v72_v5, %v68_v2  ;;  %v75_v8 = vmul.f32 %v73_v6, %v69_v3  ;;  %v76_v9 = vadd.f32 %v72_v5, %v68_v2  ;;  %v77_v10 = vadd.f32 %v73_v6, %v69_v3  ;;  %p158_p10 = scmp.ne.s32.totalorder %s95_s21, %s157_s1  ;;  %p163_p12 = scmp.lt.s32.totalorder %s157_s1, %s157_s1 }
  0x21   :  { %v78_v11 = vadd.f32 %v75_v8, %v74_v7  ;;  %v80_v12 = vadd.f32 %v77_v10, %v76_v9  ;;  %p164_p13 = por %p163_p12, %p162_p11 }
  0x23   :  { %84 = vst [vmem:[#allocation7] sm:$0xff] %v78_v11  ;;  %88 = vst [vmem:[#allocation7 + $0x8] sm:$0xff] %v80_v12  ;;  %p165_p0 = pnand %p164_p13, %p158_p10 }
  0x25   :  { %168 = shalt.err (!%p165_p0)
}
  0x26   :  { %100 = dma.vmem_to_hbm [thread:$0]  %s95_s21, 256, %s224_s2, [#allocation4], %s184_s12, %s184_s12, %s185_s13  }
  0x27   :  { %181 = dma.done.wait [#allocation4], 256  }
  0x28   :  { %182 = vsyncadd [#allocation4], 4294967040 }
  0x29   :  { %104 = vsyncpa [#allocation3], 1 }
  0x2a   :  { %105 = vsyncpa [#allocation6], 1 }
  0x2b   :  { %106 = vsyncpa [#allocation4], 1 }

</bundles_post_ra>
